<compile_context>
chip_gen: v6e
topology: v6e:2x2x1
jax: 0.10.0
libtpu: 0.0.40
codegen_flags: <defaults>
</compile_context>

<pallas_src>
import functools
import math

import numpy as np
import jax
import jax.numpy as jnp
from jax.experimental import pallas as pl
from jax.experimental.pallas import tpu as pltpu

_BN_EPS = 1e-5
_CONV_GEMM_DTYPE = jnp.bfloat16   # MXU-friendly conv operands, f32 accumulation


# ------------------------------ small helpers -------------------------------

def _full_spec(shape):
    nd = len(shape)
    return pl.BlockSpec(shape, lambda i, _nd=nd: (0,) * _nd)


def _softplus(x):                       # numerically stable softplus
    return jnp.maximum(x, 0.0) + jnp.log(1.0 + jnp.exp(-jnp.abs(x)))


def _mish(x):
    return x * jnp.tanh(_softplus(x))


def _sigmoid(x):                        # divide-free sigmoid (tanh is EUP)
    return 0.5 * (jnp.tanh(0.5 * x) + 1.0)


def _activate(x, act):
    if act == "relu":
        return jnp.maximum(x, 0.0)
    if act == "sigmoid":
        return _sigmoid(x)
    if act == "tanh":
        return jnp.tanh(x)
    if act == "mish":
        return _mish(x)
    return x


# ----------------------- conv (3x3, pad 1) as lane-dense GEMM ----------------

def _conv_gemm_kernel(col_ref, w_ref, o_ref, *, act):
    acc = jnp.dot(w_ref[0], col_ref[0, 0], preferred_element_type=jnp.float32)
    o_ref[0, 0] = _activate(acc, act)


def _conv_gemm_bias_kernel(col_ref, w_ref, b_ref, o_ref, *, act):
    acc = jnp.dot(w_ref[0], col_ref[0, 0], preferred_element_type=jnp.float32)
    acc = acc + b_ref[0]
    o_ref[0, 0] = _activate(acc, act)


def _im2col(x, groups):
    """(B, Cin, H, W) -> (B, groups, cin_g*9, H*W), zero pad 1, stride 1."""
    B, Cin, H, W = x.shape
    xp = jnp.pad(x, ((0, 0), (0, 0), (1, 1), (1, 1)))
    taps = [xp[:, :, kh:kh + H, kw:kw + W] for kh in range(3) for kw in range(3)]
    col = jnp.stack(taps, axis=2)                       # (B, Cin, 9, H, W)
    return col.reshape(B, groups, (Cin // groups) * 9, H * W)
    # TODO(synk): for large feature maps replace this XLA-level im2col (9x HBM
    # read) with an in-kernel halo / shifted-accumulation formulation.


def conv2d_3x3(x, w, b=None, groups=1, act="none", compute_dtype=_CONV_GEMM_DTYPE):
    """Grouped 3x3 conv fused into one pallas_call, grid=(batch, group)."""
    B, Cin, H, W = x.shape
    Cout = w.shape[0]
    cin_g, cout_g = Cin // groups, Cout // groups
    K, N = cin_g * 9, H * W

    col = _im2col(x, groups).astype(compute_dtype)                 # (B,G,K,N)
    wg = w.reshape(groups, cout_g, K).astype(compute_dtype)        # (G,Cog,K)

    in_specs = [
        pl.BlockSpec((1, 1, K, N), lambda bi, gi: (bi, gi, 0, 0)),
        pl.BlockSpec((1, cout_g, K), lambda bi, gi: (gi, 0, 0)),
    ]
    operands = [col, wg]
    if b is not None:
        in_specs.append(pl.BlockSpec((1, cout_g, 1), lambda bi, gi: (gi, 0, 0)))
        operands.append(b.reshape(groups, cout_g, 1).astype(jnp.float32))
        kernel = functools.partial(_conv_gemm_bias_kernel, act=act)
    else:
        kernel = functools.partial(_conv_gemm_kernel, act=act)

    out = pl.pallas_call(
        kernel,
        out_shape=jax.ShapeDtypeStruct((B, groups, cout_g, N), jnp.float32),
        grid=(B, groups),
        in_specs=in_specs,
        out_specs=pl.BlockSpec((1, 1, cout_g, N), lambda bi, gi: (bi, gi, 0, 0)),
        compiler_params=pltpu.CompilerParams(
            dimension_semantics=("parallel", "parallel")),
    )(*operands)
    return out.reshape(B, Cout, H, W)


def conv_bn_relu(x, w, groups=1):
    # Eval-mode BatchNorm with default params folds to a pure scale.
    scale = 1.0 / math.sqrt(1.0 + _BN_EPS)
    return conv2d_3x3(x, w * scale, None, groups=groups, act="relu")


def trans_conf(p, vis_feat, ir_feat, groups):
    x = jnp.concatenate([vis_feat, ir_feat], axis=1)
    x = conv_bn_relu(x, p["c1_w"], groups=1)
    x = conv_bn_relu(x, p["c2_w"], groups=groups)
    return conv2d_3x3(x, p["c3_w"], p["c3_b"], groups=groups, act="sigmoid")


# --------------------------- TransInten (fused MLP) --------------------------

def _inten_kernel(a_ref, b_ref, w1_ref, b1_ref, w2_ref, b2_ref,
                  w3a_ref, w3b_ref, b3_ref, w4_ref, b4_ref, o_ref):
    f1 = _mish(jnp.dot(a_ref[...], w1_ref[...],
                       preferred_element_type=jnp.float32) + b1_ref[...])
    f2 = _mish(jnp.dot(b_ref[...], w2_ref[...],
                       preferred_element_type=jnp.float32) + b2_ref[...])
    f3 = _mish(jnp.dot(f1, w3a_ref[...], preferred_element_type=jnp.float32)
               + jnp.dot(f2, w3b_ref[...], preferred_element_type=jnp.float32)
               + b3_ref[...])
    o_ref[...] = _sigmoid(jnp.dot(f3, w4_ref[...],
                                  preferred_element_type=jnp.float32) + b4_ref[...])


def trans_inten(p, a, b):
    a_p = jnp.mean(a, axis=(2, 3)).astype(jnp.float32)     # (B, a_ch)
    b_p = jnp.mean(b, axis=(2, 3)).astype(jnp.float32)     # (B, b_ch)
    a_ch = p["l1"]["w"].shape[0]
    w3 = p["l3"]["w"]
    ops = [a_p, b_p,
           p["l1"]["w"], p["l1"]["b"].reshape(1, -1),
           p["l2"]["w"], p["l2"]["b"].reshape(1, -1),
           w3[:a_ch], w3[a_ch:], p["l3"]["b"].reshape(1, -1),
           p["l4"]["w"], p["l4"]["b"].reshape(1, -1)]
    ops = [o.astype(jnp.float32) for o in ops]
    B = a_p.shape[0]
    return pl.pallas_call(
        _inten_kernel,
        out_shape=jax.ShapeDtypeStruct((B, a_ch), jnp.float32),
        grid=(1,),
        in_specs=[_full_spec(o.shape) for o in ops],
        out_specs=_full_spec((B, a_ch)),
        compiler_params=pltpu.CompilerParams(dimension_semantics=("arbitrary",)),
    )(*ops)                                                  # (B, a_ch)


# -------------------- ScaleRatio (conv + pool + heads, fused) ----------------

def _sr_kernel(col_ref, w_ref, wh_ref, bh_ref, o_ref, *, alpha):
    feat = jnp.maximum(
        jnp.dot(w_ref[0], col_ref[0, 0], preferred_element_type=jnp.float32), 0.0)
    pooled = jnp.mean(feat, axis=1, keepdims=True)            # (hidden, 1)
    lin = jnp.dot(wh_ref[...], pooled,
                  preferred_element_type=jnp.float32) + bh_ref[...]
    o_ref[0] = alpha * jnp.tanh(lin) + 1.0


def scale_ratio(p, a, b, groups, alpha=0.9):
    x = jnp.concatenate([a, b], axis=1)
    B, Cin, H, W = x.shape
    hidden = p["c1_w"].shape[0]                               # groups*inner_multi
    K, N = Cin * 9, H * W
    bn = 1.0 / math.sqrt(1.0 + _BN_EPS)
    col = _im2col(x, 1).astype(jnp.float32)                   # (B,1,K,N)
    wg = (p["c1_w"] * bn).reshape(1, hidden, K).astype(jnp.float32)
    wh = jnp.concatenate([p["scale"]["w"], p["ratio"]["w"]], axis=1).T  # (2g,hid)
    bh = jnp.concatenate([p["scale"]["b"], p["ratio"]["b"]]).reshape(2 * groups, 1)

    out = pl.pallas_call(
        functools.partial(_sr_kernel, alpha=alpha),
        out_shape=jax.ShapeDtypeStruct((B, 2 * groups, 1), jnp.float32),
        grid=(B,),
        in_specs=[
            pl.BlockSpec((1, 1, K, N), lambda bi: (bi, 0, 0, 0)),
            pl.BlockSpec((1, hidden, K), lambda bi: (0, 0, 0)),
            pl.BlockSpec((2 * groups, hidden), lambda bi: (0, 0)),
            pl.BlockSpec((2 * groups, 1), lambda bi: (0, 0)),
        ],
        out_specs=pl.BlockSpec((1, 2 * groups, 1), lambda bi: (bi, 0, 0)),
        compiler_params=pltpu.CompilerParams(dimension_semantics=("parallel",)),
    )(col, wg, wh, bh)
    return out.reshape(B, 2 * groups)     # [:, :groups]=scale, [:, groups:]=ratio


# -------- multi_group: fused (inten * ir) + reflect-pad patch transfer + blend

def _transfer_blend_kernel(ir_ref, vis_ref, conf_ref, inten_ref,
                           pht_ref, pw_ref, eh_ref, ewt_ref, o_ref, *, eps):
    x = ir_ref[...] * inten_ref[...]          # (Cg*H, W) — inten folded in
    v = vis_ref[...]
    pht, pwm = pht_ref[...], pw_ref[...]
    eh, ewt = eh_ref[...], ewt_ref[...]

    def pmean(t):   # (Cg*H, W) -> (Cg*nph, npw): reflect-padded per-patch mean
        return jnp.dot(pht, jnp.dot(t, pwm, preferred_element_type=jnp.float32),
                       preferred_element_type=jnp.float32)

    def expand(m):  # (Cg*nph, npw) -> (Cg*H, W): broadcast patch stat back
        return jnp.dot(eh, jnp.dot(m, ewt, preferred_element_type=jnp.float32),
                       preferred_element_type=jnp.float32)

    x_m = pmean(x)
    v_m = pmean(v)
    x_std = jnp.sqrt(jnp.maximum(pmean(x * x) - x_m * x_m, 0.0))
    v_std = jnp.sqrt(jnp.maximum(pmean(v * v) - v_m * v_m, 0.0))
    inv = pl.reciprocal(expand(x_std) + eps, approx=True)
    trans = (x - expand(x_m)) * inv * expand(v_std) + expand(v_m)
    c = conf_ref[...]
    o_ref[...] = c * trans + (1.0 - c) * v    # confidence blend fused in


def _pool_mats(size, patch):
    """P: (size, n) reflect-padded patch-mean weights; E: (size, n) membership."""
    n = math.ceil(size / patch)
    padded = n * patch
    pad = padded - size
    src = np.concatenate([np.arange(size), size - 2 - np.arange(pad)]).astype(np.int64)
    band = np.arange(padded) // patch
    P = np.zeros((size, n), np.float64)
    np.add.at(P, (src, band), 1.0 / patch)
    E = np.zeros((size, n), np.float32)
    E[np.arange(size), np.arange(size) // patch] = 1.0
    return P.astype(np.float32), E


def multi_group(ir, ir_feat, vis_feat, confidence, inten, chunks, patch_list,
                scale, hw_ratio, eps=1e-9):
    # `ir` is unused: the pool(ir)/com_conf branch of the reference is dead code
    # (immediately overwritten by `compound_ir = trans_ir`).
    patch_w = [round(scale[i] * patch_list[i]) for i in range(chunks)]
    patch_h = [round(hw_ratio[i] * patch_w[i]) for i in range(chunks)]
    patch_w = [2 if v < 2 else v for v in patch_w]
    patch_h = [2 if v < 2 else v for v in patch_h]

    B, Ct, H, W = ir_feat.shape            # B == 1 per call
    Cg = Ct // chunks
    outs = []
    for g in range(chunks):
        ph = patch_h[g] if patch_h[g] <= H else H
        pw = patch_w[g] if patch_w[g] <= W else W
        nph, npw = math.ceil(H / ph), math.ceil(W / pw)
        Ph, Eh = _pool_mats(H, ph)
        Pw, Ew = _pool_mats(W, pw)
        eye = np.eye(Cg, dtype=np.float32)
        pht_bd = jnp.asarray(np.kron(eye, Ph.T))   # (Cg*nph, Cg*H)
        eh_bd = jnp.asarray(np.kron(eye, Eh))      # (Cg*H, Cg*nph)
        pw_m = jnp.asarray(Pw)                     # (W, npw)
        ewt = jnp.asarray(Ew.T)                    # (npw, W)

        sl = slice(g * Cg, (g + 1) * Cg)
        ir2 = ir_feat[0, sl].reshape(Cg * H, W)
        vis2 = vis_feat[0, sl].reshape(Cg * H, W)
        conf2 = confidence[0, sl].reshape(Cg * H, W)
        inten_col = jnp.repeat(inten[sl], H).reshape(Cg * H, 1)

        ops = [ir2, vis2, conf2, inten_col, pht_bd, pw_m, eh_bd, ewt]
        ops = [o.astype(jnp.float32) for o in ops]
        out2 = pl.pallas_call(
            functools.partial(_transfer_blend_kernel, eps=eps),
            out_shape=jax.ShapeDtypeStruct((Cg * H, W), jnp.float32),
            grid=(1,),
            in_specs=[_full_spec(o.shape) for o in ops],
            out_specs=_full_spec((Cg * H, W)),
            compiler_params=pltpu.CompilerParams(
                dimension_semantics=("arbitrary",)),
        )(*ops)
        outs.append(out2.reshape(1, Cg, H, W))
    return jnp.concatenate(outs, axis=1)


# ----------------------------------- Trans -----------------------------------

def trans_forward(params, vis_feat, ir_feat, ir, groups=4,
                  patch_list=(8, 16, 32, 32)):
    B = vis_feat.shape[0]
    inten = trans_inten(params["inten"], ir_feat, vis_feat)        # (B, a_ch)
    conf = trans_conf(params["conf"], vis_feat, ir_feat, groups)   # (B, a_ch, H, W)
    sr = scale_ratio(params["sr"], vis_feat, ir_feat, groups)      # (B, 2*groups)
    # Single host sync: scale/ratio drive the (static) patch sizes, mirroring
    # the torch `.flatten().tolist()`.
    # TODO(synk): arbitrary per-image patch sizes imply per-shape recompiles of
    # the transfer kernel (inherent to the reference semantics).
    sr_host = jax.device_get(sr)
    outs = []
    for i in range(B):
        sc = [float(v) for v in sr_host[i, :groups]]
        rt = [float(v) for v in sr_host[i, groups:]]
        outs.append(multi_group(
            ir[i:i + 1], ir_feat[i:i + 1], vis_feat[i:i + 1], conf[i:i + 1],
            inten[i], chunks=groups, patch_list=list(patch_list),
            scale=sc, hw_ratio=rt))
    return jnp.concatenate(outs, axis=0)


# ------------------------------ parameter init -------------------------------

def init_linear(key, din, dout):
    kw, kb = jax.random.split(key)
    return {"w": jax.random.normal(kw, (din, dout), jnp.float32) / math.sqrt(din),
            "b": jax.random.normal(kb, (dout,), jnp.float32) * 0.01}


def init_conv_w(key, cin, cout, groups=1):
    cin_g = cin // groups
    return jax.random.normal(key, (cout, cin_g, 3, 3), jnp.float32) / math.sqrt(cin_g * 9)


def init_params(key, a_ch, b_ch, groups=4, inner_multi=4):
    ks = jax.random.split(key, 12)
    return {
        "inten": {
            "l1": init_linear(ks[0], a_ch, a_ch),
            "l2": init_linear(ks[1], b_ch, b_ch),
            "l3": init_linear(ks[2], a_ch + b_ch, a_ch),
            "l4": init_linear(ks[3], a_ch, a_ch),
        },
        "conf": {
            "c1_w": init_conv_w(ks[4], a_ch + b_ch, a_ch, 1),
            "c2_w": init_conv_w(ks[5], a_ch, a_ch, groups),
            "c3_w": init_conv_w(ks[6], a_ch, a_ch, groups),
            "c3_b": jax.random.normal(ks[7], (a_ch,), jnp.float32) * 0.01,
        },
        "sr": {
            "c1_w": init_conv_w(ks[8], a_ch + b_ch, groups * inner_multi, 1),
            "scale": init_linear(ks[9], groups * inner_multi, groups),
            "ratio": init_linear(ks[10], groups * inner_multi, groups),
        },
    }


if __name__ == "__main__":
    a_ch = b_ch = 8
    B, H, W = 2, 16, 16
    groups = 4
    patch_list = [8, 16, 32, 32]

    key = jax.random.PRNGKey(0)
    k_params, k_vis, k_irf, k_ir = jax.random.split(key, 4)
    params = init_params(k_params, a_ch, b_ch, groups)
    vis_feat = jax.random.normal(k_vis, (B, b_ch, H, W), jnp.float32)
    ir_feat = jax.random.normal(k_irf, (B, a_ch, H, W), jnp.float32)
    ir = jax.random.uniform(k_ir, (B, 1, H, W), jnp.float32)

    out = trans_forward(params, vis_feat, ir_feat, ir,
                        groups=groups, patch_list=patch_list)
    out = jax.block_until_ready(out)
    assert out.shape == (B, a_ch, H, W), out.shape
    assert bool(jnp.all(jnp.isfinite(out)))
    print("KERNEL_OK")
</pallas_src>

<mosaic_0001>
module attributes {stable_mosaic.version = 11 : i64} {
  func.func @_inten_kernel(%arg0: i32, %arg1: memref<2x8xf32, #tpu.memory_space<vmem>>, %arg2: memref<2x8xf32, #tpu.memory_space<vmem>>, %arg3: memref<8x8xf32, #tpu.memory_space<vmem>>, %arg4: memref<1x8xf32, #tpu.memory_space<vmem>>, %arg5: memref<8x8xf32, #tpu.memory_space<vmem>>, %arg6: memref<1x8xf32, #tpu.memory_space<vmem>>, %arg7: memref<8x8xf32, #tpu.memory_space<vmem>>, %arg8: memref<8x8xf32, #tpu.memory_space<vmem>>, %arg9: memref<1x8xf32, #tpu.memory_space<vmem>>, %arg10: memref<8x8xf32, #tpu.memory_space<vmem>>, %arg11: memref<1x8xf32, #tpu.memory_space<vmem>>, %arg12: memref<2x8xf32, #tpu.memory_space<vmem>>) attributes {dimension_semantics = [#tpu.dimension_semantics<arbitrary>], iteration_bounds = array<i64: 1>, scalar_prefetch = 0 : i64, scratch_operands = 0 : i64, tpu.core_type = #tpu.core_type<tc>, window_params = [{pipeline_mode = #tpu.pipeline_mode<synchronous>, transform_indices = @transform_0, window_bounds = array<i64: 2, 8>}, {pipeline_mode = #tpu.pipeline_mode<synchronous>, transform_indices = @transform_1, window_bounds = array<i64: 2, 8>}, {pipeline_mode = #tpu.pipeline_mode<synchronous>, transform_indices = @transform_2, window_bounds = array<i64: 8, 8>}, {pipeline_mode = #tpu.pipeline_mode<synchronous>, transform_indices = @transform_3, window_bounds = array<i64: 1, 8>}, {pipeline_mode = #tpu.pipeline_mode<synchronous>, transform_indices = @transform_4, window_bounds = array<i64: 8, 8>}, {pipeline_mode = #tpu.pipeline_mode<synchronous>, transform_indices = @transform_5, window_bounds = array<i64: 1, 8>}, {pipeline_mode = #tpu.pipeline_mode<synchronous>, transform_indices = @transform_6, window_bounds = array<i64: 8, 8>}, {pipeline_mode = #tpu.pipeline_mode<synchronous>, transform_indices = @transform_7, window_bounds = array<i64: 8, 8>}, {pipeline_mode = #tpu.pipeline_mode<synchronous>, transform_indices = @transform_8, window_bounds = array<i64: 1, 8>}, {pipeline_mode = #tpu.pipeline_mode<synchronous>, transform_indices = @transform_9, window_bounds = array<i64: 8, 8>}, {pipeline_mode = #tpu.pipeline_mode<synchronous>, transform_indices = @transform_10, window_bounds = array<i64: 1, 8>}, {pipeline_mode = #tpu.pipeline_mode<synchronous>, transform_indices = @transform_11, window_bounds = array<i64: 2, 8>}]} {
    %c0 = arith.constant 0 : index
    %c0_0 = arith.constant 0 : index
    %0 = vector.load %arg1[%c0, %c0_0] : memref<2x8xf32, #tpu.memory_space<vmem>>, vector<2x8xf32>
    %c0_1 = arith.constant 0 : index
    %c0_2 = arith.constant 0 : index
    %1 = vector.load %arg3[%c0_1, %c0_2] : memref<8x8xf32, #tpu.memory_space<vmem>>, vector<8x8xf32>
    %cst = arith.constant dense<0.000000e+00> : vector<2x8xf32>
    %2 = tpu.matmul %0, %1, %cst {dimension_numbers = #tpu.dot_dimension_numbers<[1], [0], [0], [1], [0, 0, 1, 1], [], []>} : vector<2x8xf32>, vector<8x8xf32>, vector<2x8xf32> -> vector<2x8xf32>
    %c0_3 = arith.constant 0 : index
    %c0_4 = arith.constant 0 : index
    %3 = vector.load %arg4[%c0_3, %c0_4] : memref<1x8xf32, #tpu.memory_space<vmem>>, vector<1x8xf32>
    %4 = vector.broadcast %3 : vector<1x8xf32> to vector<2x8xf32>
    %5 = arith.addf %2, %4 : vector<2x8xf32>
    %cst_5 = arith.constant 0.000000e+00 : f32
    %6 = vector.broadcast %cst_5 : f32 to vector<2x8xf32>
    %7 = arith.maximumf %5, %6 : vector<2x8xf32>
    %8 = math.absf %5 : vector<2x8xf32>
    %cst_6 = arith.constant 0.000000e+00 : f32
    %9 = vector.broadcast %cst_6 : f32 to vector<2x8xf32>
    %10 = arith.subf %9, %8 : vector<2x8xf32>
    %11 = math.exp %10 : vector<2x8xf32>
    %cst_7 = arith.constant 1.000000e+00 : f32
    %12 = vector.broadcast %cst_7 : f32 to vector<2x8xf32>
    %13 = arith.addf %12, %11 : vector<2x8xf32>
    %14 = math.log %13 : vector<2x8xf32>
    %15 = arith.addf %7, %14 : vector<2x8xf32>
    %16 = math.tanh %15 : vector<2x8xf32>
    %17 = arith.mulf %5, %16 : vector<2x8xf32>
    %c0_8 = arith.constant 0 : index
    %c0_9 = arith.constant 0 : index
    %18 = vector.load %arg2[%c0_8, %c0_9] : memref<2x8xf32, #tpu.memory_space<vmem>>, vector<2x8xf32>
    %c0_10 = arith.constant 0 : index
    %c0_11 = arith.constant 0 : index
    %19 = vector.load %arg5[%c0_10, %c0_11] : memref<8x8xf32, #tpu.memory_space<vmem>>, vector<8x8xf32>
    %cst_12 = arith.constant dense<0.000000e+00> : vector<2x8xf32>
    %20 = tpu.matmul %18, %19, %cst_12 {dimension_numbers = #tpu.dot_dimension_numbers<[1], [0], [0], [1], [0, 0, 1, 1], [], []>} : vector<2x8xf32>, vector<8x8xf32>, vector<2x8xf32> -> vector<2x8xf32>
    %c0_13 = arith.constant 0 : index
    %c0_14 = arith.constant 0 : index
    %21 = vector.load %arg6[%c0_13, %c0_14] : memref<1x8xf32, #tpu.memory_space<vmem>>, vector<1x8xf32>
    %22 = vector.broadcast %21 : vector<1x8xf32> to vector<2x8xf32>
    %23 = arith.addf %20, %22 : vector<2x8xf32>
    %cst_15 = arith.constant 0.000000e+00 : f32
    %24 = vector.broadcast %cst_15 : f32 to vector<2x8xf32>
    %25 = arith.maximumf %23, %24 : vector<2x8xf32>
    %26 = math.absf %23 : vector<2x8xf32>
    %cst_16 = arith.constant 0.000000e+00 : f32
    %27 = vector.broadcast %cst_16 : f32 to vector<2x8xf32>
    %28 = arith.subf %27, %26 : vector<2x8xf32>
    %29 = math.exp %28 : vector<2x8xf32>
    %cst_17 = arith.constant 1.000000e+00 : f32
    %30 = vector.broadcast %cst_17 : f32 to vector<2x8xf32>
    %31 = arith.addf %30, %29 : vector<2x8xf32>
    %32 = math.log %31 : vector<2x8xf32>
    %33 = arith.addf %25, %32 : vector<2x8xf32>
    %34 = math.tanh %33 : vector<2x8xf32>
    %35 = arith.mulf %23, %34 : vector<2x8xf32>
    %c0_18 = arith.constant 0 : index
    %c0_19 = arith.constant 0 : index
    %36 = vector.load %arg7[%c0_18, %c0_19] : memref<8x8xf32, #tpu.memory_space<vmem>>, vector<8x8xf32>
    %cst_20 = arith.constant dense<0.000000e+00> : vector<2x8xf32>
    %37 = tpu.matmul %17, %36, %cst_20 {dimension_numbers = #tpu.dot_dimension_numbers<[1], [0], [0], [1], [0, 0, 1, 1], [], []>} : vector<2x8xf32>, vector<8x8xf32>, vector<2x8xf32> -> vector<2x8xf32>
    %c0_21 = arith.constant 0 : index
    %c0_22 = arith.constant 0 : index
    %38 = vector.load %arg8[%c0_21, %c0_22] : memref<8x8xf32, #tpu.memory_space<vmem>>, vector<8x8xf32>
    %cst_23 = arith.constant dense<0.000000e+00> : vector<2x8xf32>
    %39 = tpu.matmul %35, %38, %cst_23 {dimension_numbers = #tpu.dot_dimension_numbers<[1], [0], [0], [1], [0, 0, 1, 1], [], []>} : vector<2x8xf32>, vector<8x8xf32>, vector<2x8xf32> -> vector<2x8xf32>
    %40 = arith.addf %37, %39 : vector<2x8xf32>
    %c0_24 = arith.constant 0 : index
    %c0_25 = arith.constant 0 : index
    %41 = vector.load %arg9[%c0_24, %c0_25] : memref<1x8xf32, #tpu.memory_space<vmem>>, vector<1x8xf32>
    %42 = vector.broadcast %41 : vector<1x8xf32> to vector<2x8xf32>
    %43 = arith.addf %40, %42 : vector<2x8xf32>
    %cst_26 = arith.constant 0.000000e+00 : f32
    %44 = vector.broadcast %cst_26 : f32 to vector<2x8xf32>
    %45 = arith.maximumf %43, %44 : vector<2x8xf32>
    %46 = math.absf %43 : vector<2x8xf32>
    %cst_27 = arith.constant 0.000000e+00 : f32
    %47 = vector.broadcast %cst_27 : f32 to vector<2x8xf32>
    %48 = arith.subf %47, %46 : vector<2x8xf32>
    %49 = math.exp %48 : vector<2x8xf32>
    %cst_28 = arith.constant 1.000000e+00 : f32
    %50 = vector.broadcast %cst_28 : f32 to vector<2x8xf32>
    %51 = arith.addf %50, %49 : vector<2x8xf32>
    %52 = math.log %51 : vector<2x8xf32>
    %53 = arith.addf %45, %52 : vector<2x8xf32>
    %54 = math.tanh %53 : vector<2x8xf32>
    %55 = arith.mulf %43, %54 : vector<2x8xf32>
    %c0_29 = arith.constant 0 : index
    %c0_30 = arith.constant 0 : index
    %56 = vector.load %arg10[%c0_29, %c0_30] : memref<8x8xf32, #tpu.memory_space<vmem>>, vector<8x8xf32>
    %cst_31 = arith.constant dense<0.000000e+00> : vector<2x8xf32>
    %57 = tpu.matmul %55, %56, %cst_31 {dimension_numbers = #tpu.dot_dimension_numbers<[1], [0], [0], [1], [0, 0, 1, 1], [], []>} : vector<2x8xf32>, vector<8x8xf32>, vector<2x8xf32> -> vector<2x8xf32>
    %c0_32 = arith.constant 0 : index
    %c0_33 = arith.constant 0 : index
    %58 = vector.load %arg11[%c0_32, %c0_33] : memref<1x8xf32, #tpu.memory_space<vmem>>, vector<1x8xf32>
    %59 = vector.broadcast %58 : vector<1x8xf32> to vector<2x8xf32>
    %60 = arith.addf %57, %59 : vector<2x8xf32>
    %cst_34 = arith.constant 5.000000e-01 : f32
    %61 = vector.broadcast %cst_34 : f32 to vector<2x8xf32>
    %62 = arith.mulf %61, %60 : vector<2x8xf32>
    %63 = math.tanh %62 : vector<2x8xf32>
    %cst_35 = arith.constant 1.000000e+00 : f32
    %64 = vector.broadcast %cst_35 : f32 to vector<2x8xf32>
    %65 = arith.addf %63, %64 : vector<2x8xf32>
    %cst_36 = arith.constant 5.000000e-01 : f32
    %66 = vector.broadcast %cst_36 : f32 to vector<2x8xf32>
    %67 = arith.mulf %66, %65 : vector<2x8xf32>
    %c0_37 = arith.constant 0 : index
    %c0_38 = arith.constant 0 : index
    %68 = vector.load %arg12[%c0_37, %c0_38] : memref<2x8xf32, #tpu.memory_space<vmem>>, vector<2x8xf32>
    tpu.vector_store %arg12[%c0_37, %c0_38], %67 {strides = array<i32>} : memref<2x8xf32, #tpu.memory_space<vmem>>, vector<2x8xf32>,
    return
  }
  func.func @transform_0(%arg0: i32) -> (i32, i32) {
    %c0_i32 = arith.constant 0 : i32
    %c0_i32_0 = arith.constant 0 : i32
    %c0_i32_1 = arith.constant 0 : i32
    return %c0_i32, %c0_i32_0 : i32, i32
  }
  func.func @transform_1(%arg0: i32) -> (i32, i32) {
    %c0_i32 = arith.constant 0 : i32
    %c0_i32_0 = arith.constant 0 : i32
    %c0_i32_1 = arith.constant 0 : i32
    return %c0_i32, %c0_i32_0 : i32, i32
  }
  func.func @transform_2(%arg0: i32) -> (i32, i32) {
    %c0_i32 = arith.constant 0 : i32
    %c0_i32_0 = arith.constant 0 : i32
    %c0_i32_1 = arith.constant 0 : i32
    return %c0_i32, %c0_i32_0 : i32, i32
  }
  func.func @transform_3(%arg0: i32) -> (i32, i32) {
    %c0_i32 = arith.constant 0 : i32
    %c0_i32_0 = arith.constant 0 : i32
    %c0_i32_1 = arith.constant 0 : i32
    return %c0_i32, %c0_i32_0 : i32, i32
  }
  func.func @transform_4(%arg0: i32) -> (i32, i32) {
    %c0_i32 = arith.constant 0 : i32
    %c0_i32_0 = arith.constant 0 : i32
    %c0_i32_1 = arith.constant 0 : i32
    return %c0_i32, %c0_i32_0 : i32, i32
  }
  func.func @transform_5(%arg0: i32) -> (i32, i32) {
    %c0_i32 = arith.constant 0 : i32
    %c0_i32_0 = arith.constant 0 : i32
    %c0_i32_1 = arith.constant 0 : i32
    return %c0_i32, %c0_i32_0 : i32, i32
  }
  func.func @transform_6(%arg0: i32) -> (i32, i32) {
    %c0_i32 = arith.constant 0 : i32
    %c0_i32_0 = arith.constant 0 : i32
    %c0_i32_1 = arith.constant 0 : i32
    return %c0_i32, %c0_i32_0 : i32, i32
  }
  func.func @transform_7(%arg0: i32) -> (i32, i32) {
    %c0_i32 = arith.constant 0 : i32
    %c0_i32_0 = arith.constant 0 : i32
    %c0_i32_1 = arith.constant 0 : i32
    return %c0_i32, %c0_i32_0 : i32, i32
  }
  func.func @transform_8(%arg0: i32) -> (i32, i32) {
    %c0_i32 = arith.constant 0 : i32
    %c0_i32_0 = arith.constant 0 : i32
    %c0_i32_1 = arith.constant 0 : i32
    return %c0_i32, %c0_i32_0 : i32, i32
  }
  func.func @transform_9(%arg0: i32) -> (i32, i32) {
    %c0_i32 = arith.constant 0 : i32
    %c0_i32_0 = arith.constant 0 : i32
    %c0_i32_1 = arith.constant 0 : i32
    return %c0_i32, %c0_i32_0 : i32, i32
  }
  func.func @transform_10(%arg0: i32) -> (i32, i32) {
    %c0_i32 = arith.constant 0 : i32
    %c0_i32_0 = arith.constant 0 : i32
    %c0_i32_1 = arith.constant 0 : i32
    return %c0_i32, %c0_i32_0 : i32, i32
  }
  func.func @transform_11(%arg0: i32) -> (i32, i32) {
    %c0_i32 = arith.constant 0 : i32
    %c0_i32_0 = arith.constant 0 : i32
    %c0_i32_1 = arith.constant 0 : i32
    return %c0_i32, %c0_i32_0 : i32, i32
  }
}

</mosaic_0001>

<bundles_post_ra>
// kernel: tpu_custom_call.1
= control target key start
LH: loop header
LB: loop body
LE: loop exit
PB: predicated region body
PF: predicated region fallthrough
CT: control target
= control target key end

     0   :  { %16 = vsyncpa [#allocation3], 0  ;;  %s976_s0 = inlined_call_operand.hbm [shape: f32[2,8], index: 0, kind: input, shape index: {}]   ;;  %s977_s1 = inlined_call_operand.hbm [shape: f32[2,8], index: 1, kind: input, shape index: {}]   ;;  %s978_s2 = inlined_call_operand.hbm [shape: f32[8,8], index: 2, kind: input, shape index: {}]   ;;  %s979_s3 = inlined_call_operand.hbm [shape: f32[1,8], index: 3, kind: input, shape index: {}]   ;;  %s980_s4 = inlined_call_operand.hbm [shape: f32[8,8], index: 4, kind: input, shape index: {}]   ;;  %s981_s5 = inlined_call_operand.hbm [shape: f32[1,8], index: 5, kind: input, shape index: {}]   ;;  %s982_s6 = inlined_call_operand.vmem [shape: f32[8,8], index: 6, kind: input, shape index: {}]   ;;  %s983_s7 = inlined_call_operand.hbm [shape: f32[8,8], index: 7, kind: input, shape index: {}]   ;;  %s984_s8 = inlined_call_operand.hbm [shape: f32[1,8], index: 8, kind: input, shape index: {}]   ;;  %s985_s9 = inlined_call_operand.vmem [shape: f32[8,8], index: 9, kind: input, shape index: {}]   ;;  %s986_s10 = inlined_call_operand.vmem [shape: f32[1,8], index: 10, kind: input, shape index: {}]   ;;  %s987_s11 = inlined_call_operand.hbm [shape: f32[2,8], index: 11, kind: output, shape index: {}]  }
   0x1   :  { %17 = vsyncpa [#allocation6], 0 }
   0x2   :  { %18 = vsyncpa [#allocation9], 0 }
   0x3   :  { %19 = vsyncpa [#allocation12], 0 }
   0x4   :  { %20 = vsyncpa [#allocation15], 0 }
   0x5   :  { %21 = vsyncpa [#allocation4], 0  ;;  %s859_s17 = smov [#allocation5]   ;;  %s860_s19 = smov [#allocation8]  }
   0x6   :  { %s38_s18 = sshll.u32 %s859_s17, 4  ;;  %s58_s20 = sshll.u32 %s860_s19, 4  ;;  %s39_s18 = int_to_ptr.vmem [resolvable:$true] %s38_s18  ;;  %s59_s20 = int_to_ptr.vmem [resolvable:$true] %s58_s20 }
   0x7   :  { %s675_s21 = scalar_lea.vmem %s39_s18, 32  ;;  %p680_p1 = scmp.lt.s32.totalorder %s39_s18, %s39_s18 }
   0x8   :  { %p676_p0 = scmp.ne.s32.totalorder %s39_s18, %s675_s21  ;;  %p681_p2 = scmp.lt.s32.totalorder %s675_s21, %s675_s21 }
   0xa   :  { %p682_p3 = por %p681_p2, %p680_p1 }
   0xc   :  { %p683_p4 = pnand %p682_p3, %p676_p0 }
   0xe   :  { %686 = shalt.err (!%p683_p4)
}
   0xf   :  { %41 = dma.hbm_to_vmem [thread:$0]  %s977_s1, 32, %s39_s18, [#allocation6]  }
  0x10   :  { %s695_s24 = scalar_lea.vmem %s59_s20, 16  ;;  %s699_s25 = scalar_lea.vmem %s59_s20, 32 }
  0x11   :  { %p696_p5 = scmp.ne.s32.totalorder %s59_s20, %s695_s24  ;;  %p700_p6 = scmp.lt.s32.totalorder %s59_s20, %s59_s20 }
  0x12   :  { %p701_p7 = scmp.lt.s32.totalorder %s699_s25, %s695_s24 }
  0x14   :  { %p702_p8 = por %p701_p7, %p700_p6 }
  0x16   :  { %p703_p9 = pnand %p702_p8, %p696_p5 }
  0x18   :  { %706 = shalt.err (!%p703_p9)
}
  0x19   :  { %61 = dma.hbm_to_vmem [thread:$0]  %s979_s3, 16, %s59_s20, [#allocation9]  }
  0x1a   :  { %s861_s28 = smov [#allocation11]   ;;  %s862_s30 = smov [#allocation2]  }
  0x1b   :  { %s78_s29 = sshll.u32 %s861_s28, 4  ;;  %s28_s12 = sshll.u32 %s862_s30, 4  ;;  %s79_s29 = int_to_ptr.vmem [resolvable:$true] %s78_s29  ;;  %s29_s12 = int_to_ptr.vmem [resolvable:$true] %s28_s12 }
  0x1c   :  { %s715_s13 = scalar_lea.vmem %s79_s29, 16  ;;  %s719_s1 = scalar_lea.vmem %s79_s29, 32 }
  0x1d   :  { %p716_p10 = scmp.ne.s32.totalorder %s79_s29, %s715_s13  ;;  %p720_p11 = scmp.lt.s32.totalorder %s79_s29, %s79_s29 }
  0x1e   :  { %p721_p12 = scmp.lt.s32.totalorder %s719_s1, %s715_s13 }
  0x20   :  { %p722_p13 = por %p721_p12, %p720_p11 }
  0x22   :  { %p723_p0 = pnand %p722_p13, %p716_p10 }
  0x24   :  { %726 = shalt.err (!%p723_p0)
}
  0x25   :  { %81 = dma.hbm_to_vmem [thread:$0]  %s981_s5, 16, %s79_s29, [#allocation12]  }
  0x26   :  { %s735_s16 = scalar_lea.vmem %s29_s12, 32  ;;  %p740_p2 = scmp.lt.s32.totalorder %s29_s12, %s29_s12 }
  0x27   :  { %p736_p1 = scmp.ne.s32.totalorder %s29_s12, %s735_s16  ;;  %p741_p3 = scmp.lt.s32.totalorder %s735_s16, %s735_s16 }
  0x29   :  { %p742_p4 = por %p741_p3, %p740_p2 }
  0x2b   :  { %p743_p5 = pnand %p742_p4, %p736_p1 }
  0x2d   :  { %746 = shalt.err (!%p743_p5)
}
  0x2e   :  { %31 = dma.hbm_to_vmem [thread:$0]  %s976_s0, 32, %s29_s12, [#allocation3]  }
  0x2f   :  { %s863_s18 = smov [#allocation7]   ;;  %s864_s20 = smov [#allocation10]  }
  0x30   :  { %s48_s19 = sshll.u32 %s863_s18, 4  ;;  %s68_s21 = sshll.u32 %s864_s20, 4  ;;  %s49_s19 = int_to_ptr.vmem [resolvable:$true] %s48_s19  ;;  %s69_s21 = int_to_ptr.vmem [resolvable:$true] %s68_s21 }
  0x31   :  { %s755_s22 = scalar_lea.vmem %s49_s19, 128  ;;  %p760_p7 = scmp.lt.s32.totalorder %s49_s19, %s49_s19 }
  0x32   :  { %p756_p6 = scmp.ne.s32.totalorder %s49_s19, %s755_s22  ;;  %p761_p8 = scmp.lt.s32.totalorder %s755_s22, %s755_s22 }
  0x34   :  { %p762_p9 = por %p761_p8, %p760_p7 }
  0x36   :  { %p763_p10 = pnand %p762_p9, %p756_p6 }
  0x38   :  { %766 = shalt.err (!%p763_p10)
}
  0x39   :  { %51 = dma.hbm_to_vmem [thread:$0]  %s978_s2, 128, %s49_s19, [#allocation6]  }
  0x3a   :  { %s775_s24 = scalar_lea.vmem %s69_s21, 128  ;;  %p780_p12 = scmp.lt.s32.totalorder %s69_s21, %s69_s21 }
  0x3b   :  { %p776_p11 = scmp.ne.s32.totalorder %s69_s21, %s775_s24  ;;  %p781_p13 = scmp.lt.s32.totalorder %s775_s24, %s775_s24 }
  0x3d   :  { %p782_p0 = por %p781_p13, %p780_p12 }
  0x3f   :  { %p783_p1 = pnand %p782_p0, %p776_p11 }
  0x41   :  { %786 = shalt.err (!%p783_p1)
}
  0x42   :  { %71 = dma.hbm_to_vmem [thread:$0]  %s980_s4, 128, %s69_s21, [#allocation9]  }
  0x43   :  { %s865_s26 = smov [#allocation13]   ;;  %s866_s28 = smov [#allocation14]  }
  0x44   :  { %s90_s27 = sshll.u32 %s865_s26, 4  ;;  %s100_s29 = sshll.u32 %s866_s28, 4  ;;  %s91_s27 = int_to_ptr.vmem [resolvable:$true] %s90_s27  ;;  %s101_s29 = int_to_ptr.vmem [resolvable:$true] %s100_s29 }
  0x45   :  { %s795_s30 = scalar_lea.vmem %s91_s27, 128  ;;  %p800_p3 = scmp.lt.s32.totalorder %s91_s27, %s91_s27 }
  0x46   :  { %p796_p2 = scmp.ne.s32.totalorder %s91_s27, %s795_s30  ;;  %p801_p4 = scmp.lt.s32.totalorder %s795_s30, %s795_s30 }
  0x48   :  { %p802_p5 = por %p801_p4, %p800_p3 }
  0x4a   :  { %p803_p6 = pnand %p802_p5, %p796_p2 }
  0x4c   :  { %806 = shalt.err (!%p803_p6)
}
  0x4d   :  { %93 = dma.hbm_to_vmem [thread:$0]  %s983_s7, 128, %s91_s27, [#allocation12]  }
  0x4e   :  { %s815_s13 = scalar_lea.vmem %s101_s29, 16  ;;  %s819_s4 = scalar_lea.vmem %s101_s29, 32 }
  0x4f   :  { %p816_p7 = scmp.ne.s32.totalorder %s101_s29, %s815_s13  ;;  %p820_p8 = scmp.lt.s32.totalorder %s101_s29, %s101_s29 }
  0x50   :  { %p821_p9 = scmp.lt.s32.totalorder %s819_s4, %s815_s13 }
  0x52   :  { %p822_p10 = por %p821_p9, %p820_p8 }
  0x54   :  { %p823_p11 = pnand %p822_p10, %p816_p7 }
  0x56   :  { %826 = shalt.err (!%p823_p11)
}
  0x57   :  { %103 = dma.hbm_to_vmem [thread:$0]  %s984_s8, 16, %s101_s29, [#allocation15]  }
  0x58   :  { %847 = dma.done.wait [#allocation3], 32  }
  0x59   :  { %848 = vsyncadd [#allocation3], 4294967264 }
  0x5a   :  { %849 = dma.done.wait [#allocation6], 160  }
  0x5b   :  { %850 = vsyncadd [#allocation6], 4294967136 }
  0x5c   :  { %851 = dma.done.wait [#allocation9], 144  }
  0x5d   :  { %852 = vsyncadd [#allocation9], 4294967152 }
  0x5e   :  { %853 = dma.done.wait [#allocation12], 144  }
  0x5f   :  { %854 = vsyncadd [#allocation12], 4294967152 }
  0x60   :  { %855 = dma.done.wait [#allocation15], 16  }
  0x61   :  { %856 = vsyncadd [#allocation15], 4294967280  ;;  %v867_v0 = vmov 0.0   ;;  %vm868_vm0 = vmmov 0   ;;  %vm141_vm1 = vcmask 64512   ;;  %v133_v1 = vld [vmem:[#allocation7] sm:$0xff] }
  0x62   :  { %611 = vmatprep.subr.mxu0 %v867_v0  ;;  %616 = vmatprep.subr.mxu1 %v867_v0  ;;  %v227_v2 = vld [vmem:[#allocation10] sm:$0xff]  ;;  %v132_v3 = vld [vmem:[#allocation2] sm:$0x3]  ;;  %v226_v4 = vld [vmem:[#allocation5] sm:$0x3]  ;;  %s869_s3 = smov [#allocation16]  }
  0x63   :  { %613 = vmatprep.mubr.msk.f32.mxu0 %vm868_vm0, %v867_v0  ;;  %618 = vmatprep.mubr.msk.f32.mxu1 %vm868_vm0, %v867_v0  ;;  %v320_v5 = vld [vmem:[#allocation13] sm:$0xff]  ;;  %v319_v6 = vld [vmem:[%s982_s6] sm:$0xff]  ;;  %v592_v7 = vld [vmem:[#allocation8] ss:$0 sm:$0xff]  ;;  %s579_s17 = sshll.u32 %s869_s3, 4  ;;  %vm571_vm2 = vcmask 58368   ;;  %s580_s17 = int_to_ptr.vmem [resolvable:$true] %s579_s17 }
  0x64   :  { %612 = vmatpush3.msra.mxu0 %v133_v1  ;;  %617 = vmatpush3.msra.mxu1 %v227_v2  ;;  %v594_v8 = vld [vmem:[#allocation11] ss:$0 sm:$0xff]  ;;  %v486_v37 = vld [vmem:[%s985_s9] sm:$0xff]  ;;  %s827_s18 = scalar_lea.vmem %s580_s17, 32  ;;  %p832_p13 = scmp.lt.s32.totalorder %s580_s17, %s580_s17 }
  0x65   :  { %614 = vmatmul.mubr.msk.f32.vlgmr.msra.gmra.mxu0 %vm141_vm1, %v132_v3  ;;  %619 = vmatmul.mubr.msk.f32.vlgmr.msra.gmra.mxu1 %vm141_vm1, %v226_v4  ;;  %v598_v40 = vld [vmem:[#allocation14] ss:$0 sm:$0xff]  ;;  %p828_p12 = scmp.ne.s32.totalorder %s580_s17, %s827_s18  ;;  %p833_p0 = scmp.lt.s32.totalorder %s827_s18, %s827_s18 }
  0x66   :  { %621 = vmatprep.subr.mxu0 %v867_v0  ;;  %626 = vmatprep.subr.mxu1 %v867_v0  ;;  %v599_v56 = vld [vmem:[%s986_s10] ss:$0 sm:$0xff] }
  0x67   :  { %623 = vmatprep.mubr.msk.f32.mxu0 %vm868_vm0, %v867_v0  ;;  %628 = vmatprep.mubr.msk.f32.mxu1 %vm868_vm0, %v867_v0  ;;  %p834_p1 = por %p833_p0, %p832_p13 }
  0x68   :  { %622 = vmatpush3.msra.mxu0 %v320_v5  ;;  %627 = vmatpush3.msra.mxu1 %v319_v6 }
  0x69   :  { %631 = vmatprep.subr.mxu0 %v867_v0  ;;  %p835_p2 = pnand %p834_p1, %p828_p12 }
 0x125   :  { %v211_v9 = vpop.f32.mrf.mxu0  ;;  %v304_v10 = vpop.f32.mrf.mxu1 }
 0x126   :  { %v212_v11 = vadd.f32 %v592_v7, %v211_v9  ;;  %v305_v12 = vadd.f32 %v594_v8, %v304_v10 }
 0x127   :  { %v615_v13 = vpop.f32.mrf.mxu0  ;;  %v620_v14 = vpop.f32.mrf.mxu1 }
 0x128   :  { %v216_v15 = vand.u32 2147483647, %v212_v11  ;;  %v309_v16 = vand.u32 2147483647, %v305_v12  ;;  %v215_v27 = vmax.f32 %v212_v11, 0.0  ;;  %v308_v29 = vmax.f32 %v305_v12, 0.0 }
 0x12a   :  { %v217_v17 = vsub.f32 0.0, %v216_v15  ;;  %v310_v18 = vsub.f32 0.0, %v309_v16 }
 0x12c   :  { %v218_v19 = vmul.f32 1.442695, %v217_v17  ;;  %v311_v20 = vmul.f32 1.442695, %v310_v18 }
 0x12e   :  { %647 = vpow2.f32 %v218_v19 }
 0x12f   :  { %649 = vpow2.f32 %v311_v20 }
 0x13b   :  { %v648_v21 = vpop.eup %647 }
 0x13c   :  { %v650_v22 = vpop.eup %649  ;;  %v220_v23 = vadd.f32 1.0, %v648_v21 }
 0x13d   :  { %v313_v24 = vadd.f32 1.0, %v650_v22 }
 0x13e   :  { %651 = vlog2.f32 %v220_v23 }
 0x13f   :  { %653 = vlog2.f32 %v313_v24 }
 0x14b   :  { %v652_v25 = vpop.eup %651 }
 0x14c   :  { %v654_v26 = vpop.eup %653  ;;  %v222_v28 = vmul.f32 0.6931472, %v652_v25 }
 0x14d   :  { %v315_v30 = vmul.f32 0.6931472, %v654_v26 }
 0x14e   :  { %v223_v31 = vadd.f32 %v222_v28, %v215_v27 }
 0x14f   :  { %v316_v32 = vadd.f32 %v315_v30, %v308_v29 }
 0x150   :  { %655 = vtanh.f32 %v223_v31 }
 0x151   :  { %657 = vtanh.f32 %v316_v32 }
 0x15d   :  { %v656_v33 = vpop.eup %655 }
 0x15e   :  { %v658_v34 = vpop.eup %657  ;;  %v225_v35 = vmul.f32 %v656_v33, %v212_v11 }
 0x15f   :  { %v318_v36 = vmul.f32 %v658_v34, %v305_v12 }
 0x160   :  { %629 = vmatmul.mubr.msk.f32.vlgmr.msra.gmra.mxu1 %vm141_vm1, %v225_v35 }
 0x161   :  { %624 = vmatmul.mubr.msk.f32.vlgmr.msra.gmra.mxu0 %vm141_vm1, %v318_v36 }
 0x162   :  { %633 = vmatprep.mubr.msk.f32.mxu0 %vm868_vm0, %v867_v0  ;;  %632 = vmatpush3.msra.mxu0 %v486_v37 }
 0x220   :  { %v463_v38 = vpop.f32.mrf.mxu1 }
 0x221   :  { %v390_v39 = vpop.f32.mrf.mxu0 }
 0x222   :  { %v464_v41 = vadd.f32 %v463_v38, %v390_v39  ;;  %v630_v42 = vpop.f32.mrf.mxu1 }
 0x223   :  { %v625_v43 = vpop.f32.mrf.mxu0 }
 0x224   :  { %v474_v44 = vadd.f32 %v598_v40, %v464_v41 }
 0x226   :  { %v476_v45 = vand.u32 2147483647, %v474_v44  ;;  %v475_v51 = vmax.f32 %v474_v44, 0.0 }
 0x228   :  { %v477_v46 = vsub.f32 0.0, %v476_v45 }
 0x22a   :  { %v478_v47 = vmul.f32 1.442695, %v477_v46 }
 0x22c   :  { %659 = vpow2.f32 %v478_v47 }
 0x239   :  { %v660_v48 = vpop.eup %659 }
 0x23a   :  { %v480_v49 = vadd.f32 1.0, %v660_v48 }
 0x23c   :  { %661 = vlog2.f32 %v480_v49 }
 0x249   :  { %v662_v50 = vpop.eup %661 }
 0x24a   :  { %v482_v52 = vmul.f32 0.6931472, %v662_v50 }
 0x24c   :  { %v483_v53 = vadd.f32 %v482_v52, %v475_v51 }
 0x24e   :  { %663 = vtanh.f32 %v483_v53 }
 0x25b   :  { %v664_v54 = vpop.eup %663 }
 0x25c   :  { %v485_v55 = vmul.f32 %v664_v54, %v474_v44 }
 0x25e   :  { %634 = vmatmul.mubr.msk.f32.vlgmr.msra.gmra.mxu0 %vm141_vm1, %v485_v55 }
 0x31e   :  { %v563_v57 = vpop.f32.mrf.mxu0 }
 0x31f   :  { %v564_v58 = vadd.f32 %v599_v56, %v563_v57 }
 0x320   :  { %v635_v59 = vpop.f32.mrf.mxu0 }
 0x321   :  { %v567_v60 = vmul.f32 0.5, %v564_v58 }
 0x323   :  { %665 = vtanh.f32 %v567_v60 }
 0x330   :  { %v666_v61 = vpop.eup %665 }
 0x331   :  { %v569_v62 = vadd.f32 1.0, %v666_v61 }
 0x333   :  { %v570_v63 = vmul.f32 0.5, %v569_v62 }
 0x335   :  { %572 = vst.msk [vmem:[#allocation16] sm:$0x3] %vm571_vm2, %v570_v63 }
 0x336   :  { %838 = shalt.err (!%p835_p2)
}
 0x337   :  { %582 = dma.vmem_to_hbm [thread:$0]  %s580_s17, 32, %s987_s11, [#allocation4]  }
 0x338   :  { %857 = dma.done.wait [#allocation4], 32  }
 0x339   :  { %858 = vsyncadd [#allocation4], 4294967264 }
 0x33a   :  { %586 = vsyncpa [#allocation3], 1 }
 0x33b   :  { %587 = vsyncpa [#allocation6], 1 }
 0x33c   :  { %588 = vsyncpa [#allocation9], 1 }
 0x33d   :  { %589 = vsyncpa [#allocation12], 1 }
 0x33e   :  { %590 = vsyncpa [#allocation15], 1 }
 0x33f   :  { %591 = vsyncpa [#allocation4], 1 }

</bundles_post_ra>
